<compile_context>
chip_gen: v5e
topology: v5e:2x2
jax: 0.10.0
libtpu: 0.0.40
codegen_flags: <defaults>
</compile_context>

<pallas_src>
import jax
import jax.numpy as jnp
from jax import lax
from jax.experimental import pallas as pl
from jax.experimental.pallas import tpu as pltpu

# deterministic "parameter": softmax temperature for the similarity logits
TEMPERATURE = 0.05
INV_TEMPERATURE = 1.0 / TEMPERATURE


def _vmem_capacity_bytes():
    try:
        return int(pltpu.get_tpu_info().vmem_capacity_bytes)
    except Exception:
        return 64 * 1024 * 1024  # conservative fallback (v7x per-TC physical)


_VMEM_CAP = _vmem_capacity_bytes()
_VMEM_LIMIT = int(_VMEM_CAP * 0.75)    # scoped limit, leaves compiler headroom
_BLOCK_BUDGET = int(_VMEM_CAP * 0.40)  # budget for double-buffered input blocks


def _largest_aligned_divisor(n, target, align):
    """Largest t <= target with n % t == 0 and t % align == 0 (n % align == 0)."""
    t = min(target, n)
    t -= t % align
    while t > align and n % t:
        t -= align
    return max(t, align)


# ---------------------------------------------------------------------------
# Stage 1: masked pooling + L2 normalization, gridded over (batch, seq)
# ---------------------------------------------------------------------------
def _pool_norm_kernel(h_ref, m_ref, out_ref):
    k = pl.program_id(1)

    @pl.when(k == 0)
    def _():
        out_ref[...] = jnp.zeros_like(out_ref)

    # Masked sum over this sequence tile on the MXU:
    #   (Bt, 1, St) x (Bt, St, H) -> (Bt, 1, H), accumulated in f32.
    out_ref[...] += lax.dot_general(
        m_ref[...], h_ref[...],
        dimension_numbers=(((2,), (1,)), ((0,), (0,))),
        preferred_element_type=jnp.float32,
    )

    @pl.when(k == pl.num_programs(1) - 1)
    def _():
        s = out_ref[...]
        # mean-pool divide dropped: the per-row 1/count cancels under L2 norm.
        out_ref[...] = s * lax.rsqrt(
            jnp.sum(s * s, axis=-1, keepdims=True) + 1e-6)


def _pool_normalize(hidden, mask):
    """hidden: [B, S, H] (any float dtype), mask: [B, S] -> normalized [B, H] f32."""
    B, S, H = hidden.shape
    dt = hidden.dtype
    itemsize = jnp.dtype(dt).itemsize

    # Batch tile: 8 sublane-aligned rows (>=2 parallel grid steps once B >= 16,
    # keeps both v7x TensorCores busy), or the full batch when B < 8.
    if B <= 8:
        Bt, Bp = B, B
    else:
        Bt = 8
        Bp = -(-B // 8) * 8

    # Seq tile: largest lane-aligned tile whose double-buffered hidden + mask
    # blocks fit the per-generation VMEM budget (bias: big St, small Bt).
    bytes_per_seq = 2 * Bt * H * itemsize        # hidden block, double-buffered
    bytes_per_seq += 2 * Bt * 8 * itemsize       # (Bt,1,St) mask block (sublane-padded)
    max_st = max(_BLOCK_BUDGET // max(bytes_per_seq, 1), 1)
    if S <= max_st:
        St, Sp = S, S
    else:
        St = max((max_st // 128) * 128, 128)
        Sp = -(-S // St) * St

    mask = mask.astype(dt)
    if Bp != B or Sp != S:
        hidden = jnp.pad(hidden, ((0, Bp - B), (0, Sp - S), (0, 0)))
        mask = jnp.pad(mask, ((0, Bp - B), (0, Sp - S)))
    # [B, S] -> [B, 1, S]: free bitcast, keeps S on the lane axis (no 128x pad).
    mask3 = mask.reshape(Bp, 1, Sp)

    out = pl.pallas_call(
        _pool_norm_kernel,
        out_shape=jax.ShapeDtypeStruct((Bp, 1, H), jnp.float32),
        grid_spec=pltpu.PrefetchScalarGridSpec(
            num_scalar_prefetch=0,
            grid=(Bp // Bt, Sp // St),
            in_specs=[
                pl.BlockSpec((Bt, St, H), lambda i, k: (i, k, 0)),
                pl.BlockSpec((Bt, 1, St), lambda i, k: (i, 0, k)),
            ],
            out_specs=pl.BlockSpec((Bt, 1, H), lambda i, k: (i, 0, 0)),
        ),
        compiler_params=pltpu.CompilerParams(
            dimension_semantics=("parallel", "arbitrary"),
            vmem_limit_bytes=_VMEM_LIMIT,
        ),
    )(hidden, mask3)

    return out.reshape(Bp, H)[:B]


# ---------------------------------------------------------------------------
# Stage 2: in-batch similarity logits, tiled (TM, TN) MXU matmul
# ---------------------------------------------------------------------------
def _similarity_kernel(q_ref, d_ref, out_ref):
    # Contract H on both operands (no explicit transpose); f32 accumulation.
    out_ref[...] = lax.dot_general(
        q_ref[...], d_ref[...],
        dimension_numbers=(((1,), (1,)), ((), ())),
        preferred_element_type=jnp.float32,
    ) * INV_TEMPERATURE


def _similarity(q_emb, d_emb):
    """q_emb: [B, H] f32, d_emb: [N, H] f32 -> logits [B, N] f32."""
    B, H = q_emb.shape
    N = d_emb.shape[0]

    # bf16 operands are MXU-native on all generations (f32 runs multi-pass);
    # normalization was already done in f32, so this is essentially free.
    q_emb = q_emb.astype(jnp.bfloat16)
    d_emb = d_emb.astype(jnp.bfloat16)

    # Lane-dense logits: pad doc rows to a multiple of 128 (no masked vst).
    Npad = max(-(-N // 128) * 128, 128)
    if Npad != N:
        d_emb = jnp.pad(d_emb, ((0, Npad - N), (0, 0)))
    # Sublane-aligned query rows.
    Bp = B if B <= 8 else -(-B // 8) * 8
    if Bp != B:
        q_emb = jnp.pad(q_emb, ((0, Bp - B), (0, 0)))

    TM = Bp if Bp <= 8 else _largest_aligned_divisor(Bp, 256, 8)
    TN = _largest_aligned_divisor(Npad, 256, 128)

    logits_pad = pl.pallas_call(
        _similarity_kernel,
        out_shape=jax.ShapeDtypeStruct((Bp, Npad), jnp.float32),
        grid_spec=pltpu.PrefetchScalarGridSpec(
            num_scalar_prefetch=0,
            grid=(Bp // TM, Npad // TN),
            in_specs=[
                pl.BlockSpec((TM, H), lambda i, j: (i, 0)),
                pl.BlockSpec((TN, H), lambda i, j: (j, 0)),
            ],
            out_specs=pl.BlockSpec((TM, TN), lambda i, j: (i, j)),
        ),
        compiler_params=pltpu.CompilerParams(
            dimension_semantics=("parallel", "parallel"),
            vmem_limit_bytes=_VMEM_LIMIT,
        ),
    )(q_emb, d_emb)

    return logits_pad[:B, :N]


# ---------------------------------------------------------------------------
# Forward + loss
# ---------------------------------------------------------------------------
def retriever_forward(q_hidden, q_mask, d_hidden, d_mask):
    # Inputs are consumed in their incoming dtype (f32 or bf16); a wrapper
    # .astype pre-pass would only add HBM traffic to a memory-bound stage.
    q_emb = _pool_normalize(q_hidden, q_mask)
    d_emb = _pool_normalize(d_hidden, d_mask)
    return _similarity(q_emb, d_emb)


def compute_loss(logits, label_id=None):
    # TODO(synk): reference compute_loss body is `pass`; standard in-batch
    # contrastive cross-entropy with diagonal labels (plain-JAX glue).
    log_probs = jax.nn.log_softmax(logits, axis=-1)
    if label_id is None:
        return -jnp.mean(jnp.diagonal(log_probs))
    return -jnp.mean(jnp.take_along_axis(log_probs, label_id[:, None], axis=-1))


def _reference_forward(q_hidden, q_mask, d_hidden, d_mask):
    def pool(h, m):
        s = jnp.einsum("bsh,bs->bh", h.astype(jnp.float32), m.astype(jnp.float32))
        return s / jnp.linalg.norm(s, axis=-1, keepdims=True)
    q = pool(q_hidden, q_mask)
    d = pool(d_hidden, d_mask)
    return (q @ d.T) * INV_TEMPERATURE


if __name__ == "__main__":
    B, S, H = 16, 256, 128  # small; H=128 / S=256 stay lane/sublane aligned

    key = jax.random.PRNGKey(0)
    kq, kd = jax.random.split(key)

    q_hidden = jax.random.normal(kq, (B, S, H), dtype=jnp.float32)
    d_hidden = jax.random.normal(kd, (B, S, H), dtype=jnp.float32)

    # deterministic variable-length prefix masks
    pos = jnp.arange(S)[None, :]
    q_len = (S - 8 * jnp.arange(B))[:, None]
    d_len = (S - 4 * jnp.arange(B))[:, None]
    q_mask = (pos < q_len).astype(jnp.float32)
    d_mask = (pos < d_len).astype(jnp.float32)

    logits = jax.block_until_ready(
        retriever_forward(q_hidden, q_mask, d_hidden, d_mask))
    loss = jax.block_until_ready(compute_loss(logits))

    assert logits.shape == (B, B) and logits.dtype == jnp.float32
    assert bool(jnp.all(jnp.isfinite(logits)))
    assert bool(jnp.isfinite(loss))

    ref = _reference_forward(q_hidden, q_mask, d_hidden, d_mask)
    max_err = float(jnp.max(jnp.abs(logits - ref)))
    assert max_err < 0.5, f"kernel/reference mismatch: max abs err {max_err}"

    print("KERNEL_OK")
</pallas_src>

<mosaic_0001>
module attributes {stable_mosaic.version = 11 : i64} {
  func.func @_pool_norm_kernel(%arg0: i32, %arg1: i32, %arg2: memref<8x256x128xf32, #tpu.memory_space<vmem>>, %arg3: memref<8x1x256xf32, #tpu.memory_space<vmem>>, %arg4: memref<8x1x128xf32, #tpu.memory_space<vmem>>) attributes {dimension_semantics = [#tpu.dimension_semantics<parallel>, #tpu.dimension_semantics<arbitrary>], iteration_bounds = array<i64: 2, 1>, scalar_prefetch = 0 : i64, scratch_operands = 0 : i64, tpu.core_type = #tpu.core_type<tc>, window_params = [{transform_indices = @transform_0, window_bounds = array<i64: 8, 256, 128>}, {transform_indices = @transform_1, window_bounds = array<i64: 8, 1, 256>}, {transform_indices = @transform_2, window_bounds = array<i64: 8, 1, 128>}]} {
    %c0_i32 = arith.constant 0 : i32
    %0 = arith.cmpi eq, %arg1, %c0_i32 : i32
    %1 = arith.extui %0 : i1 to i32
    %c0_i32_0 = arith.constant 0 : i32
    %2 = arith.cmpi ne, %1, %c0_i32_0 : i32
    scf.if %2 {
      %cst_14 = arith.constant 0.000000e+00 : f32
      %12 = vector.broadcast %cst_14 : f32 to vector<8x1x128xf32>
      %c0_15 = arith.constant 0 : index
      %c0_16 = arith.constant 0 : index
      %c0_17 = arith.constant 0 : index
      %13 = vector.load %arg4[%c0_15, %c0_16, %c0_17] : memref<8x1x128xf32, #tpu.memory_space<vmem>>, vector<8x1x128xf32>
      tpu.vector_store %arg4[%c0_15, %c0_16, %c0_17], %12 {strides = array<i32>} : memref<8x1x128xf32, #tpu.memory_space<vmem>>, vector<8x1x128xf32>,
    } else {
    }
    %c0 = arith.constant 0 : index
    %c0_1 = arith.constant 0 : index
    %c0_2 = arith.constant 0 : index
    %3 = vector.load %arg4[%c0, %c0_1, %c0_2] : memref<8x1x128xf32, #tpu.memory_space<vmem>>, vector<8x1x128xf32>
    %c0_3 = arith.constant 0 : index
    %c0_4 = arith.constant 0 : index
    %c0_5 = arith.constant 0 : index
    %4 = vector.load %arg3[%c0_3, %c0_4, %c0_5] : memref<8x1x256xf32, #tpu.memory_space<vmem>>, vector<8x1x256xf32>
    %c0_6 = arith.constant 0 : index
    %c0_7 = arith.constant 0 : index
    %c0_8 = arith.constant 0 : index
    %5 = vector.load %arg2[%c0_6, %c0_7, %c0_8] : memref<8x256x128xf32, #tpu.memory_space<vmem>>, vector<8x256x128xf32>
    %cst = arith.constant dense<0.000000e+00> : vector<8x1x128xf32>
    %6 = tpu.matmul %4, %5, %cst {dimension_numbers = #tpu.dot_dimension_numbers<[2], [1], [1], [2], [0, 0, 0, 1, 1, 2], [0], [0]>} : vector<8x1x256xf32>, vector<8x256x128xf32>, vector<8x1x128xf32> -> vector<8x1x128xf32>
    %7 = arith.addf %3, %6 : vector<8x1x128xf32>
    %c0_9 = arith.constant 0 : index
    %c0_10 = arith.constant 0 : index
    %c0_11 = arith.constant 0 : index
    %8 = vector.load %arg4[%c0_9, %c0_10, %c0_11] : memref<8x1x128xf32, #tpu.memory_space<vmem>>, vector<8x1x128xf32>
    tpu.vector_store %arg4[%c0_9, %c0_10, %c0_11], %7 {strides = array<i32>} : memref<8x1x128xf32, #tpu.memory_space<vmem>>, vector<8x1x128xf32>,
    %c0_i32_12 = arith.constant 0 : i32
    %9 = arith.cmpi eq, %arg1, %c0_i32_12 : i32
    %10 = arith.extui %9 : i1 to i32
    %c0_i32_13 = arith.constant 0 : i32
    %11 = arith.cmpi ne, %10, %c0_i32_13 : i32
    scf.if %11 {
      %c0_14 = arith.constant 0 : index
      %c0_15 = arith.constant 0 : index
      %c0_16 = arith.constant 0 : index
      %12 = vector.load %arg4[%c0_14, %c0_15, %c0_16] : memref<8x1x128xf32, #tpu.memory_space<vmem>>, vector<8x1x128xf32>
      %13 = arith.mulf %12, %12 : vector<8x1x128xf32>
      %cst_17 = arith.constant dense<0.000000e+00> : vector<8x1xf32>
      %14 = vector.multi_reduction <add>, %13, %cst_17 [2] : vector<8x1x128xf32> to vector<8x1xf32>
      %15 = vector.shape_cast %14 : vector<8x1xf32> to vector<8x1x1xf32>
      %cst_18 = arith.constant 9.99999997E-7 : f32
      %16 = vector.broadcast %cst_18 : f32 to vector<8x1x1xf32>
      %17 = arith.addf %15, %16 : vector<8x1x1xf32>
      %18 = math.rsqrt %17 : vector<8x1x1xf32>
      %19 = vector.broadcast %18 : vector<8x1x1xf32> to vector<8x1x128xf32>
      %20 = arith.mulf %12, %19 : vector<8x1x128xf32>
      %c0_19 = arith.constant 0 : index
      %c0_20 = arith.constant 0 : index
      %c0_21 = arith.constant 0 : index
      %21 = vector.load %arg4[%c0_19, %c0_20, %c0_21] : memref<8x1x128xf32, #tpu.memory_space<vmem>>, vector<8x1x128xf32>
      tpu.vector_store %arg4[%c0_19, %c0_20, %c0_21], %20 {strides = array<i32>} : memref<8x1x128xf32, #tpu.memory_space<vmem>>, vector<8x1x128xf32>,
    } else {
    }
    return
  }
  func.func @transform_0(%arg0: i32, %arg1: i32) -> (i32, i32, i32) {
    %c0_i32 = arith.constant 0 : i32
    %c0_i32_0 = arith.constant 0 : i32
    return %arg0, %arg1, %c0_i32 : i32, i32, i32
  }
  func.func @transform_1(%arg0: i32, %arg1: i32) -> (i32, i32, i32) {
    %c0_i32 = arith.constant 0 : i32
    %c0_i32_0 = arith.constant 0 : i32
    return %arg0, %c0_i32, %arg1 : i32, i32, i32
  }
  func.func @transform_2(%arg0: i32, %arg1: i32) -> (i32, i32, i32) {
    %c0_i32 = arith.constant 0 : i32
    %c0_i32_0 = arith.constant 0 : i32
    %c0_i32_1 = arith.constant 0 : i32
    return %arg0, %c0_i32, %c0_i32_0 : i32, i32, i32
  }
}

</mosaic_0001>

<bundles_post_ra>
// kernel: tpu_custom_call.1
= control target key start
LH: loop header
LB: loop body
LE: loop exit
PB: predicated region body
PF: predicated region fallthrough
CT: control target
= control target key end

     0   :  { %s1950_s0 = inlined_call_operand.hbm [shape: f32[16,256,128], index: 0, kind: input, shape index: {}]   ;;  %s1951_s1 = inlined_call_operand.hbm [shape: f32[16,1,256], index: 1, kind: input, shape index: {}]   ;;  %s1952_s2 = inlined_call_operand.hbm [shape: f32[16,1,128], index: 2, kind: output, shape index: {}]  }
   0x1   :  { %1953 = sst [smem:[#allocation11_spill]] %s1950_s0 }
   0x2   :  { %7 = vsyncpa [#allocation3], 0 }
   0x3   :  { %9 = vsyncpa [#allocation3 + $0x1], 0 }
   0x4   :  { %10 = vsyncpa [#allocation6], 0 }
   0x5   :  { %12 = vsyncpa [#allocation6 + $0x1], 0 }
   0x6   :  { %13 = vsyncpa [#allocation4], 0 }
   0x7   :  { %15 = vsyncpa [#allocation4 + $0x1], 0  ;;  %s1446_s9 = smov 0   ;;  %s1448_s10 = smov 0  }
   0x8   :  { %s1450_s11 = smov 0   ;;  %s1452_s12 = smov 0  }
   0x9   :  { %s1454_s13 = smov 0   ;;  %s1456_s14 = smov 0  }
   0xa LB: > { %s1164_s15 = sadd.s32 4294967295, %s1422_s14   ;;  %s1165_s16 = sadd.s32 4294967294, %s1422_s14   ;;  %s1422_s14 = sphi %s1456_s14, %s21_s14   ;;  %s1418_s13 = sphi %s1454_s13, %s1964_s13   ;;  %s1414_s12 = sphi %s1452_s12, %s1963_s12   ;;  %s1410_s11 = sphi %s1450_s11, %s1962_s11   ;;  %s1406_s10 = sphi %s1448_s10, %s1961_s10   ;;  %s1402_s9 = sphi %s1446_s9, %s1960_s9  }
   0xb   : > { %s33_s17 = sadd.s32 1, %s1418_s13  ;;  %s42_s18 = sadd.s32 1, %s1410_s11 }
   0xc   : > { %p35_p0 = scmp.ge.s32.totalorder %s33_s17, 2  ;;  %p49_p1 = scmp.ne.s32.totalorder %s1410_s11, %s1406_s10 }
   0xd   : > { %p50_p2 = scmp.eq.s32.totalorder %s1422_s14, 0  ;;  %p55_p3 = scmp.ne.s32.totalorder %s1406_s10, %s1402_s9 }
   0xe   : > { %s1966_s17 = smov (%p35_p0, %s33_s17), 0  ;;  %p56_p5 = scmp.eq.s32.totalorder %s1164_s15, 0 }
   0xf   : > { %p1487_p4 = por %p50_p2, %p49_p1  ;;  %s37_s20 = ssub.s32 %s1418_s13, %s1966_s17 }
  0x10   : > { %p107_p6 = scmp.eq.s32.totalorder %s1164_s15, 1  ;;  %p40_p7 = scmp.eq.s32.totalorder %s37_s20, 0 }
  0x11   : > { %p1493_p8 = por %p56_p5, %p55_p3  ;;  %p113_p10 = scmp.eq.s32.totalorder %s1165_s16, 1 }
  0x12   : > { %p1497_p9 = por %p107_p6, %p49_p1  ;;  %p1167_p12 = scmp.ge.s32.totalorder %s1422_s14, 2 }
  0x13   : > { %s1502_s23 = scalar_select %p40_p7, %s1410_s11, %s42_s18  }
  0x14   : > { %p1504_p11 = por %p113_p10, %p55_p3  ;;  %p1203_p13 = scmp.lt.s32.totalorder %s1422_s14, 2 }
  0x15   : > { %s1511_s25 = sand.u32 1, %s1410_s11   ;;  %s1184_s27 = sshll.u32 %s1418_s13, 11 }
  0x16   : > { %s1168_s26 = sshll.u32 %s1511_s25, 11  ;;  %s1958_s0 = sld [smem:[#allocation11_spill]] }
  0x17   : > { %s137_s3 = scalar_lea.vmem [#allocation2], %s1168_s26  ;;  %p1520_p0 = pnand %p1203_p13, %p1487_p4 }
  0x18   : > { %s148_s4 = sshll.u32 %s137_s3, 4  ;;  %p1175_p1 = scmp.ge.s32.totalorder %s1422_s14, 1  ;;  %s149_s4 = int_to_ptr.vmem [resolvable:$true] %s148_s4 }
  0x19   : > { %s134_s7 = scalar_lea.sflag [#allocation3], %s1511_s25  ;;  %s1424_s8 = smov 128  }
  0x1a   : > { %s1425_s15 = smov 8   ;;  %p180_p2 = scmp.lt.s32.totalorder %s1422_s14, 3 }
  0x1b   : > { %s1172_s16 = sshll.u32 %s1511_s25, 4  ;;  %s1185_s18 = sshll.u32 %s1418_s13, 4 }
  0x1c   : > { %s145_s30 = scalar_lea.hbm %s1958_s0, %s1184_s27  ;;  %p181_p3 = pnand %p1175_p1, %p180_p2 }
  0x1d   : > { %s146_s5 = sshll.u32 %s145_s30, 4  ;;  %s169_s19 = scalar_lea.hbm %s1951_s1, %s1185_s18  ;;  %s147_s5 = int_to_ptr.hbm [resolvable:$true] %s146_s5 }
  0x1e   : > { %1195 = dma.hbm_to_vmem [thread:$0]  (!%p1520_p0), %s147_s5, 32768, %s149_s4, %s134_s7, %s1424_s8, %s1424_s8, %s1425_s15  }
  0x1f   : > { %s162_s27 = scalar_lea.vmem [#allocation5], %s1172_s16  ;;  %s170_s29 = sshll.u32 %s169_s19, 4  ;;  %s171_s29 = int_to_ptr.hbm [resolvable:$true] %s170_s29 }
  0x20   : > { %s172_s28 = sshll.u32 %s162_s27, 4  ;;  %s159_s30 = scalar_lea.sflag [#allocation6], %s1511_s25  ;;  %s173_s28 = int_to_ptr.vmem [resolvable:$true] %s172_s28 }
  0x21   : > { %s1426_s3 = smov 32   ;;  %s1427_s0 = smov 2  }
  0x22   : > { %1198 = dma.hbm_to_vmem [thread:$0]  (!%p1520_p0), %s171_s29, 256, %s173_s28, %s159_s30, %s1426_s3, %s1426_s3, %s1427_s0  }
  0x23   : > { %184 = sbr.rel (%p181_p3) target bundleno = 470 (0x1d6), region = 28  ;;  %s1538_s4 = sand.u32 (!%p181_p3), 1, %s1406_s10  }
  0x24   : > { %s1176_s5 = sshll.u32 (!%p181_p3), %s1538_s4, 11  ;;  %s187_s7 = scalar_lea.sflag (!%p181_p3), [#allocation3], %s1538_s4 }
  0x25   : > { %s1542_s8 = scalar_lea.vmem (!%p181_p3), [#allocation2], %s1176_s5 }
  0x28   : > { %1389 = dma.done.wait (%p1493_p8), %s187_s7, 32768  }
  0x29   : > { %1391 = vsyncadd (%p1493_p8), %s187_s7, 4294934528  ;;  %s1177_s0 = sshll.u32 %s1538_s4, 4  ;;  %s197_s25 = scalar_lea.sflag [#allocation6], %s1538_s4 }
  0x2a   : > { %s1550_s6 = scalar_lea.vmem [#allocation5], %s1177_s0 }
  0x2b   : > { %1393 = dma.done.wait (%p1493_p8), %s197_s25, 256  }
  0x2c   : > { %1395 = vsyncadd (%p1493_p8), %s197_s25, 4294967040  ;;  %v275_v0 = vld [vmem:[%s1542_s8 + $0x78] sm:$0xff]  ;;  %v274_v4 = vld [vmem:[%s1542_s8 + $0x70] sm:$0xff]  ;;  %s1178_s21 = sshll.u32 %s1538_s4, 3  ;;  %vm911_vm0 = vcmask 1040384   ;;  %s1180_s16 = sshll.u32 %s1414_s12, 3 }
  0x2d   : > { %v291_v1 = vld [vmem:[%s1542_s8 + $0xf8] sm:$0xff]  ;;  %521 = vmatpush.msra.mxu0 %v275_v0  ;;  %v290_v5 = vld [vmem:[%s1542_s8 + $0xf0] sm:$0xff]  ;;  %v273_v8 = vld [vmem:[%s1542_s8 + $0x68] sm:$0xff]  ;;  %s1811_s15 = scalar_lea.vmem [#allocation7], %s1178_s21  ;;  %s1051_s26 = scalar_lea.hbm %s1952_s2, %s1180_s16 }
  0x2e   : > { %v307_v2 = vld [vmem:[%s1542_s8 + $0x178] sm:$0xff]  ;;  %541 = vmatpush.msra.mxu1 %v291_v1  ;;  %v306_v6 = vld [vmem:[%s1542_s8 + $0x170] sm:$0xff]  ;;  %v289_v9 = vld [vmem:[%s1542_s8 + $0xe8] sm:$0xff]  ;;  %s1052_s19 = sshll.u32 %s1811_s15, 4  ;;  %s1054_s27 = sshll.u32 %s1051_s26, 4  ;;  %s1053_s19 = int_to_ptr.vmem [resolvable:$true] %s1052_s19  ;;  %s1055_s27 = int_to_ptr.hbm [resolvable:$true] %s1054_s27 }
  0x2f   : > { %v323_v3 = vld [vmem:[%s1542_s8 + $0x1f8] sm:$0xff]  ;;  %566 = vmatpush.msra.mxu2 %v307_v2  ;;  %v322_v7 = vld [vmem:[%s1542_s8 + $0x1f0] sm:$0xff]  ;;  %522 = vmatpush.msra.mxu0 %v274_v4  ;;  %v305_v10 = vld [vmem:[%s1542_s8 + $0x168] sm:$0xff]  ;;  %s1041_s12 = scalar_lea.sflag [#allocation4], %s1538_s4  ;;  %s1350_s28 = sshra.s32 %s1055_s27, 4  ;;  %s1351_s28 = int_to_ptr.hbm [resolvable:$true] %s1350_s28 }
  0x30   : > { %586 = vmatpush.msra.mxu3 %v323_v3  ;;  %542 = vmatpush.msra.mxu1 %v290_v5  ;;  %v321_v11 = vld [vmem:[%s1542_s8 + $0x1e8] sm:$0xff]  ;;  %v272_v12 = vld [vmem:[%s1542_s8 + $0x60] sm:$0xff]  ;;  %v271_v16 = vld [vmem:[%s1542_s8 + $0x58] sm:$0xff]  ;;  %s1352_s29 = scalar_lea.hbm %s1351_s28, 8  ;;  %s1356_s5 = scalar_lea.hbm %s1952_s2, 16 }
  0x31   : > { %567 = vmatpush.msra.mxu2 %v306_v6  ;;  %v288_v13 = vld [vmem:[%s1542_s8 + $0xe0] sm:$0xff]  ;;  %523 = vmatpush.msra.mxu0 %v273_v8  ;;  %v287_v17 = vld [vmem:[%s1542_s8 + $0xd8] sm:$0xff]  ;;  %v270_v20 = vld [vmem:[%s1542_s8 + $0x50] sm:$0xff]  ;;  %p1353_p4 = scmp.ne.s32.totalorder %s1351_s28, %s1352_s29  ;;  %p1357_p7 = scmp.lt.s32.totalorder %s1351_s28, %s1952_s2 }
  0x32   : > { %587 = vmatpush.msra.mxu3 %v322_v7  ;;  %543 = vmatpush.msra.mxu1 %v289_v9  ;;  %v304_v14 = vld [vmem:[%s1542_s8 + $0x160] sm:$0xff]  ;;  %v303_v18 = vld [vmem:[%s1542_s8 + $0x158] sm:$0xff]  ;;  %v286_v21 = vld [vmem:[%s1542_s8 + $0xd0] sm:$0xff]  ;;  %p1358_p8 = scmp.lt.s32.totalorder %s1356_s5, %s1352_s29 }
  0x33   : > { %v320_v15 = vld [vmem:[%s1542_s8 + $0x1e0] sm:$0xff]  ;;  %568 = vmatpush.msra.mxu2 %v305_v10  ;;  %524 = vmatpush.msra.mxu0 %v272_v12  ;;  %v319_v19 = vld [vmem:[%s1542_s8 + $0x1d8] sm:$0xff]  ;;  %v302_v22 = vld [vmem:[%s1542_s8 + $0x150] sm:$0xff]  ;;  %p1354_p5 = pnand %p1353_p4, %p1497_p9 }
  0x34   : > { %588 = vmatpush.msra.mxu3 %v321_v11  ;;  %544 = vmatpush.msra.mxu1 %v288_v13  ;;  %v318_v23 = vld [vmem:[%s1542_s8 + $0x1d0] sm:$0xff]  ;;  %v269_v24 = vld [vmem:[%s1542_s8 + $0x48] sm:$0xff]  ;;  %v268_v28 = vld [vmem:[%s1542_s8 + $0x40] sm:$0xff]  ;;  %p1359_p10 = por %p1358_p8, %p1357_p7 }
  0x35   : > { %569 = vmatpush.msra.mxu2 %v304_v14  ;;  %525 = vmatpush.msra.mxu0 %v271_v16  ;;  %v285_v25 = vld [vmem:[%s1542_s8 + $0xc8] sm:$0xff]  ;;  %v284_v29 = vld [vmem:[%s1542_s8 + $0xc0] sm:$0xff]  ;;  %v267_v32 = vld [vmem:[%s1542_s8 + $0x38] sm:$0xff]  ;;  %p1355_p6 = pneg %p1354_p5 }
  0x36   : > { %589 = vmatpush.msra.mxu3 %v320_v15  ;;  %545 = vmatpush.msra.mxu1 %v287_v17  ;;  %v301_v26 = vld [vmem:[%s1542_s8 + $0x148] sm:$0xff]  ;;  %v300_v30 = vld [vmem:[%s1542_s8 + $0x140] sm:$0xff]  ;;  %v283_v33 = vld [vmem:[%s1542_s8 + $0xb8] sm:$0xff] }
  0x37   : > { %570 = vmatpush.msra.mxu2 %v303_v18  ;;  %526 = vmatpush.msra.mxu0 %v270_v20  ;;  %v317_v27 = vld [vmem:[%s1542_s8 + $0x1c8] sm:$0xff]  ;;  %v316_v31 = vld [vmem:[%s1542_s8 + $0x1c0] sm:$0xff]  ;;  %v299_v34 = vld [vmem:[%s1542_s8 + $0x138] sm:$0xff]  ;;  %p1360_p13 = pnand %p1359_p10, %p1355_p6 }
  0x38   : > { %590 = vmatpush.msra.mxu3 %v319_v19  ;;  %546 = vmatpush.msra.mxu1 %v286_v21  ;;  %v315_v35 = vld [vmem:[%s1542_s8 + $0x1b8] sm:$0xff]  ;;  %v266_v36 = vld [vmem:[%s1542_s8 + $0x30] sm:$0xff]  ;;  %v265_v40 = vld [vmem:[%s1542_s8 + $0x28] sm:$0xff] }
  0x39   : > { %571 = vmatpush.msra.mxu2 %v302_v22  ;;  %527 = vmatpush.msra.mxu0 %v269_v24  ;;  %v282_v37 = vld [vmem:[%s1542_s8 + $0xb0] sm:$0xff]  ;;  %v281_v41 = vld [vmem:[%s1542_s8 + $0xa8] sm:$0xff]  ;;  %v264_v44 = vld [vmem:[%s1542_s8 + $0x20] sm:$0xff] }
  0x3a   : > { %591 = vmatpush.msra.mxu3 %v318_v23  ;;  %547 = vmatpush.msra.mxu1 %v285_v25  ;;  %v298_v38 = vld [vmem:[%s1542_s8 + $0x130] sm:$0xff]  ;;  %v297_v42 = vld [vmem:[%s1542_s8 + $0x128] sm:$0xff]  ;;  %v280_v45 = vld [vmem:[%s1542_s8 + $0xa0] sm:$0xff] }
  0x3b   : > { %572 = vmatpush.msra.mxu2 %v301_v26  ;;  %528 = vmatpush.msra.mxu0 %v268_v28  ;;  %v314_v39 = vld [vmem:[%s1542_s8 + $0x1b0] sm:$0xff]  ;;  %v313_v43 = vld [vmem:[%s1542_s8 + $0x1a8] sm:$0xff]  ;;  %v296_v46 = vld [vmem:[%s1542_s8 + $0x120] sm:$0xff] }
  0x3c   : > { %592 = vmatpush.msra.mxu3 %v317_v27  ;;  %548 = vmatpush.msra.mxu1 %v284_v29  ;;  %v312_v47 = vld [vmem:[%s1542_s8 + $0x1a0] sm:$0xff]  ;;  %v263_v48 = vld [vmem:[%s1542_s8 + $0x18] sm:$0xff]  ;;  %v262_v52 = vld [vmem:[%s1542_s8 + $0x10] sm:$0xff] }
  0x3d   : > { %573 = vmatpush.msra.mxu2 %v300_v30  ;;  %529 = vmatpush.msra.mxu0 %v267_v32  ;;  %v279_v49 = vld [vmem:[%s1542_s8 + $0x98] sm:$0xff]  ;;  %v278_v53 = vld [vmem:[%s1542_s8 + $0x90] sm:$0xff]  ;;  %v261_v56 = vld [vmem:[%s1542_s8 + $0x8] sm:$0xff] }
  0x3e   : > { %593 = vmatpush.msra.mxu3 %v316_v31  ;;  %549 = vmatpush.msra.mxu1 %v283_v33  ;;  %v295_v50 = vld [vmem:[%s1542_s8 + $0x118] sm:$0xff]  ;;  %v294_v54 = vld [vmem:[%s1542_s8 + $0x110] sm:$0xff]  ;;  %v277_v57 = vld [vmem:[%s1542_s8 + $0x88] sm:$0xff] }
  0x3f   : > { %574 = vmatpush.msra.mxu2 %v299_v34  ;;  %530 = vmatpush.msra.mxu0 %v266_v36  ;;  %v311_v51 = vld [vmem:[%s1542_s8 + $0x198] sm:$0xff]  ;;  %v310_v55 = vld [vmem:[%s1542_s8 + $0x190] sm:$0xff]  ;;  %v293_v59 = vld [vmem:[%s1542_s8 + $0x108] sm:$0xff] }
  0x40   : > { %594 = vmatpush.msra.mxu3 %v315_v35  ;;  %550 = vmatpush.msra.mxu1 %v282_v37  ;;  %v252_v58 = vld [vmem:[%s1550_s6] sm:$0x3]  ;;  %v309_v60 = vld [vmem:[%s1542_s8 + $0x188] sm:$0xff]  ;;  %v253_v3 = vld [vmem:[%s1550_s6 + $0x2] sm:$0x3] }
  0x41   : > { %575 = vmatpush.msra.mxu2 %v298_v38  ;;  %531 = vmatpush.msra.mxu0 %v265_v40  ;;  %v260_v61 = vld [vmem:[%s1542_s8] sm:$0xff]  ;;  %v517_v1 = vperm.slane %v252_v58, 0  ;;  %v518_v2 = vperm.slane %v252_v58, 1  ;;  %v339_v4 = vld [vmem:[%s1542_s8 + $0x278] sm:$0xff]  ;;  %v562_v8 = vperm.slane %v253_v3, 0  ;;  %v563_v9 = vperm.slane %v253_v3, 1 }
  0x42   : > { %595 = vmatpush.msra.mxu3 %v314_v39  ;;  %551 = vmatpush.msra.mxu1 %v281_v41  ;;  %v276_v62 = vld [vmem:[%s1542_s8 + $0x80] sm:$0xff]  ;;  %v355_v5 = vld [vmem:[%s1542_s8 + $0x2f8] sm:$0xff]  ;;  %v338_v10 = vld [vmem:[%s1542_s8 + $0x270] sm:$0xff] }
  0x43   : > { %576 = vmatpush.msra.mxu2 %v297_v42  ;;  %532 = vmatpush.msra.mxu0 %v264_v44  ;;  %v292_v63 = vld [vmem:[%s1542_s8 + $0x100] sm:$0xff]  ;;  %v371_v6 = vld [vmem:[%s1542_s8 + $0x378] sm:$0xff]  ;;  %v354_v11 = vld [vmem:[%s1542_s8 + $0x2f0] sm:$0xff] }
  0x44   : > { %596 = vmatpush.msra.mxu3 %v313_v43  ;;  %552 = vmatpush.msra.mxu1 %v280_v45  ;;  %v308_v0 = vld [vmem:[%s1542_s8 + $0x180] sm:$0xff]  ;;  %v387_v7 = vld [vmem:[%s1542_s8 + $0x3f8] sm:$0xff]  ;;  %v370_v12 = vld [vmem:[%s1542_s8 + $0x370] sm:$0xff] }
  0x45   : > { %577 = vmatpush.msra.mxu2 %v296_v46  ;;  %533 = vmatpush.msra.mxu0 %v263_v48  ;;  %v386_v13 = vld [vmem:[%s1542_s8 + $0x3f0] sm:$0xff]  ;;  %v337_v14 = vld [vmem:[%s1542_s8 + $0x268] sm:$0xff]  ;;  %v336_v18 = vld [vmem:[%s1542_s8 + $0x260] sm:$0xff] }
  0x46   : > { %597 = vmatpush.msra.mxu3 %v312_v47  ;;  %553 = vmatpush.msra.mxu1 %v279_v49  ;;  %v353_v15 = vld [vmem:[%s1542_s8 + $0x2e8] sm:$0xff]  ;;  %v352_v19 = vld [vmem:[%s1542_s8 + $0x2e0] sm:$0xff]  ;;  %v335_v22 = vld [vmem:[%s1542_s8 + $0x258] sm:$0xff] }
  0x47   : > { %578 = vmatpush.msra.mxu2 %v295_v50  ;;  %534 = vmatpush.msra.mxu0 %v262_v52  ;;  %v369_v16 = vld [vmem:[%s1542_s8 + $0x368] sm:$0xff]  ;;  %v368_v20 = vld [vmem:[%s1542_s8 + $0x360] sm:$0xff]  ;;  %v351_v23 = vld [vmem:[%s1542_s8 + $0x2d8] sm:$0xff] }
  0x48   : > { %598 = vmatpush.msra.mxu3 %v311_v51  ;;  %554 = vmatpush.msra.mxu1 %v278_v53  ;;  %v385_v17 = vld [vmem:[%s1542_s8 + $0x3e8] sm:$0xff]  ;;  %v384_v21 = vld [vmem:[%s1542_s8 + $0x3e0] sm:$0xff]  ;;  %v367_v24 = vld [vmem:[%s1542_s8 + $0x358] sm:$0xff] }
  0x49   : > { %579 = vmatpush.msra.mxu2 %v294_v54  ;;  %535 = vmatpush.msra.mxu0 %v261_v56  ;;  %v383_v25 = vld [vmem:[%s1542_s8 + $0x3d8] sm:$0xff]  ;;  %v334_v26 = vld [vmem:[%s1542_s8 + $0x250] sm:$0xff]  ;;  %v333_v30 = vld [vmem:[%s1542_s8 + $0x248] sm:$0xff] }
  0x4a   : > { %599 = vmatpush.msra.mxu3 %v310_v55  ;;  %555 = vmatpush.msra.mxu1 %v277_v57  ;;  %v350_v27 = vld [vmem:[%s1542_s8 + $0x2d0] sm:$0xff]  ;;  %v349_v31 = vld [vmem:[%s1542_s8 + $0x2c8] sm:$0xff]  ;;  %v332_v34 = vld [vmem:[%s1542_s8 + $0x240] sm:$0xff] }
  0x4b   : > { %580 = vmatpush.msra.mxu2 %v293_v59  ;;  %536 = vmatpush.msra.mxu0 %v260_v61  ;;  %v366_v28 = vld [vmem:[%s1542_s8 + $0x350] sm:$0xff]  ;;  %v365_v32 = vld [vmem:[%s1542_s8 + $0x348] sm:$0xff]  ;;  %v348_v35 = vld [vmem:[%s1542_s8 + $0x2c0] sm:$0xff] }
  0x4c   : > { %600 = vmatpush.msra.mxu3 %v309_v60  ;;  %556 = vmatpush.msra.mxu1 %v276_v62  ;;  %v382_v29 = vld [vmem:[%s1542_s8 + $0x3d0] sm:$0xff]  ;;  %v381_v33 = vld [vmem:[%s1542_s8 + $0x3c8] sm:$0xff]  ;;  %v364_v36 = vld [vmem:[%s1542_s8 + $0x340] sm:$0xff] }
  0x4d   : > { %581 = vmatpush.msra.mxu2 %v292_v63  ;;  %537 = vmatmul.f32.vlgmr.msra.gmra.mxu0 %v517_v1  ;;  %v380_v37 = vld [vmem:[%s1542_s8 + $0x3c0] sm:$0xff]  ;;  %v331_v38 = vld [vmem:[%s1542_s8 + $0x238] sm:$0xff]  ;;  %v330_v42 = vld [vmem:[%s1542_s8 + $0x230] sm:$0xff] }
  0x4e   : > { %601 = vmatpush.msra.mxu3 %v308_v0  ;;  %557 = vmatmul.f32.vlgmr.msra.gmra.mxu1 %v518_v2  ;;  %v347_v39 = vld [vmem:[%s1542_s8 + $0x2b8] sm:$0xff]  ;;  %v346_v43 = vld [vmem:[%s1542_s8 + $0x2b0] sm:$0xff]  ;;  %v329_v46 = vld [vmem:[%s1542_s8 + $0x228] sm:$0xff] }
  0x4f   : > { %611 = vmatpush.msrb.mxu0 %v339_v4  ;;  %631 = vmatpush.msrb.mxu1 %v355_v5  ;;  %v363_v40 = vld [vmem:[%s1542_s8 + $0x338] sm:$0xff]  ;;  %v362_v44 = vld [vmem:[%s1542_s8 + $0x330] sm:$0xff]  ;;  %v345_v47 = vld [vmem:[%s1542_s8 + $0x2a8] sm:$0xff] }
  0x50   : > { %656 = vmatpush.msrb.mxu2 %v371_v6  ;;  %676 = vmatpush.msrb.mxu3 %v387_v7  ;;  %v379_v41 = vld [vmem:[%s1542_s8 + $0x3b8] sm:$0xff]  ;;  %v378_v45 = vld [vmem:[%s1542_s8 + $0x3b0] sm:$0xff]  ;;  %v361_v48 = vld [vmem:[%s1542_s8 + $0x328] sm:$0xff] }
  0x51   : > { %582 = vmatmul.f32.vlgmr.msra.gmra.mxu2 %v562_v8  ;;  %602 = vmatmul.f32.vlgmr.msra.gmra.mxu3 %v563_v9  ;;  %v377_v49 = vld [vmem:[%s1542_s8 + $0x3a8] sm:$0xff]  ;;  %v328_v50 = vld [vmem:[%s1542_s8 + $0x220] sm:$0xff]  ;;  %v327_v54 = vld [vmem:[%s1542_s8 + $0x218] sm:$0xff] }
  0x52   : > { %612 = vmatpush.msrb.mxu0 %v338_v10  ;;  %632 = vmatpush.msrb.mxu1 %v354_v11  ;;  %v344_v51 = vld [vmem:[%s1542_s8 + $0x2a0] sm:$0xff]  ;;  %v343_v55 = vld [vmem:[%s1542_s8 + $0x298] sm:$0xff]  ;;  %v326_v58 = vld [vmem:[%s1542_s8 + $0x210] sm:$0xff] }
  0x53   : > { %657 = vmatpush.msrb.mxu2 %v370_v12  ;;  %677 = vmatpush.msrb.mxu3 %v386_v13  ;;  %v360_v52 = vld [vmem:[%s1542_s8 + $0x320] sm:$0xff]  ;;  %v359_v56 = vld [vmem:[%s1542_s8 + $0x318] sm:$0xff]  ;;  %v342_v59 = vld [vmem:[%s1542_s8 + $0x290] sm:$0xff] }
  0x54   : > { %613 = vmatpush.msrb.mxu0 %v337_v14  ;;  %633 = vmatpush.msrb.mxu1 %v353_v15  ;;  %v376_v53 = vld [vmem:[%s1542_s8 + $0x3a0] sm:$0xff]  ;;  %v375_v57 = vld [vmem:[%s1542_s8 + $0x398] sm:$0xff]  ;;  %v358_v60 = vld [vmem:[%s1542_s8 + $0x310] sm:$0xff] }
  0x55   : > { %658 = vmatpush.msrb.mxu2 %v369_v16  ;;  %678 = vmatpush.msrb.mxu3 %v385_v17  ;;  %v374_v61 = vld [vmem:[%s1542_s8 + $0x390] sm:$0xff]  ;;  %v325_v62 = vld [vmem:[%s1542_s8 + $0x208] sm:$0xff]  ;;  %v324_v3 = vld [vmem:[%s1542_s8 + $0x200] sm:$0xff] }
  0x56   : > { %614 = vmatpush.msrb.mxu0 %v336_v18  ;;  %634 = vmatpush.msrb.mxu1 %v352_v19  ;;  %v341_v63 = vld [vmem:[%s1542_s8 + $0x288] sm:$0xff]  ;;  %v254_v0 = vld [vmem:[%s1550_s6 + $0x4] sm:$0x3]  ;;  %v255_v9 = vld [vmem:[%s1550_s6 + $0x6] sm:$0x3] }
  0x57   : > { %659 = vmatpush.msrb.mxu2 %v368_v20  ;;  %679 = vmatpush.msrb.mxu3 %v384_v21  ;;  %v357_v1 = vld [vmem:[%s1542_s8 + $0x308] sm:$0xff]  ;;  %v340_v4 = vld [vmem:[%s1542_s8 + $0x280] sm:$0xff]  ;;  %v607_v7 = vperm.slane %v254_v0, 0  ;;  %v608_v8 = vperm.slane %v254_v0, 1  ;;  %v403_v10 = vld [vmem:[%s1542_s8 + $0x478] sm:$0xff]  ;;  %v652_v14 = vperm.slane %v255_v9, 0 }
  0x58   : > { %615 = vmatpush.msrb.mxu0 %v335_v22  ;;  %635 = vmatpush.msrb.mxu1 %v351_v23  ;;  %v373_v2 = vld [vmem:[%s1542_s8 + $0x388] sm:$0xff]  ;;  %v356_v5 = vld [vmem:[%s1542_s8 + $0x300] sm:$0xff]  ;;  %v419_v11 = vld [vmem:[%s1542_s8 + $0x4f8] sm:$0xff]  ;;  %v653_v15 = vperm.slane %v255_v9, 1 }
  0x59   : > { %660 = vmatpush.msrb.mxu2 %v367_v24  ;;  %680 = vmatpush.msrb.mxu3 %v383_v25  ;;  %v372_v6 = vld [vmem:[%s1542_s8 + $0x380] sm:$0xff]  ;;  %v435_v12 = vld [vmem:[%s1542_s8 + $0x578] sm:$0xff]  ;;  %v402_v16 = vld [vmem:[%s1542_s8 + $0x470] sm:$0xff] }
  0x5a   : > { %616 = vmatpush.msrb.mxu0 %v334_v26  ;;  %636 = vmatpush.msrb.mxu1 %v350_v27  ;;  %v451_v13 = vld [vmem:[%s1542_s8 + $0x5f8] sm:$0xff]  ;;  %v418_v17 = vld [vmem:[%s1542_s8 + $0x4f0] sm:$0xff]  ;;  %v401_v20 = vld [vmem:[%s1542_s8 + $0x468] sm:$0xff] }
  0x5b   : > { %661 = vmatpush.msrb.mxu2 %v366_v28  ;;  %681 = vmatpush.msrb.mxu3 %v382_v29  ;;  %v434_v18 = vld [vmem:[%s1542_s8 + $0x570] sm:$0xff]  ;;  %v417_v21 = vld [vmem:[%s1542_s8 + $0x4e8] sm:$0xff]  ;;  %v400_v24 = vld [vmem:[%s1542_s8 + $0x460] sm:$0xff] }
  0x5c   : > { %617 = vmatpush.msrb.mxu0 %v333_v30  ;;  %637 = vmatpush.msrb.mxu1 %v349_v31  ;;  %v450_v19 = vld [vmem:[%s1542_s8 + $0x5f0] sm:$0xff]  ;;  %v433_v22 = vld [vmem:[%s1542_s8 + $0x568] sm:$0xff]  ;;  %v416_v25 = vld [vmem:[%s1542_s8 + $0x4e0] sm:$0xff] }
  0x5d   : > { %662 = vmatpush.msrb.mxu2 %v365_v32  ;;  %682 = vmatpush.msrb.mxu3 %v381_v33  ;;  %v449_v23 = vld [vmem:[%s1542_s8 + $0x5e8] sm:$0xff]  ;;  %v432_v26 = vld [vmem:[%s1542_s8 + $0x560] sm:$0xff]  ;;  %v399_v28 = vld [vmem:[%s1542_s8 + $0x458] sm:$0xff] }
  0x5e   : > { %618 = vmatpush.msrb.mxu0 %v332_v34  ;;  %638 = vmatpush.msrb.mxu1 %v348_v35  ;;  %v448_v27 = vld [vmem:[%s1542_s8 + $0x5e0] sm:$0xff]  ;;  %v415_v29 = vld [vmem:[%s1542_s8 + $0x4d8] sm:$0xff]  ;;  %v398_v32 = vld [vmem:[%s1542_s8 + $0x450] sm:$0xff] }
  0x5f   : > { %663 = vmatpush.msrb.mxu2 %v364_v36  ;;  %683 = vmatpush.msrb.mxu3 %v380_v37  ;;  %v431_v30 = vld [vmem:[%s1542_s8 + $0x558] sm:$0xff]  ;;  %v414_v33 = vld [vmem:[%s1542_s8 + $0x4d0] sm:$0xff]  ;;  %v397_v36 = vld [vmem:[%s1542_s8 + $0x448] sm:$0xff] }
  0x60   : > { %619 = vmatpush.msrb.mxu0 %v331_v38  ;;  %639 = vmatpush.msrb.mxu1 %v347_v39  ;;  %v447_v31 = vld [vmem:[%s1542_s8 + $0x5d8] sm:$0xff]  ;;  %v430_v34 = vld [vmem:[%s1542_s8 + $0x550] sm:$0xff]  ;;  %v413_v37 = vld [vmem:[%s1542_s8 + $0x4c8] sm:$0xff] }
  0x61   : > { %664 = vmatpush.msrb.mxu2 %v363_v40  ;;  %684 = vmatpush.msrb.mxu3 %v379_v41  ;;  %v446_v35 = vld [vmem:[%s1542_s8 + $0x5d0] sm:$0xff]  ;;  %v429_v38 = vld [vmem:[%s1542_s8 + $0x548] sm:$0xff]  ;;  %v396_v40 = vld [vmem:[%s1542_s8 + $0x440] sm:$0xff] }
  0x62   : > { %620 = vmatpush.msrb.mxu0 %v330_v42  ;;  %640 = vmatpush.msrb.mxu1 %v346_v43  ;;  %v445_v39 = vld [vmem:[%s1542_s8 + $0x5c8] sm:$0xff]  ;;  %v412_v41 = vld [vmem:[%s1542_s8 + $0x4c0] sm:$0xff]  ;;  %v390_v0 = vld [vmem:[%s1542_s8 + $0x410] sm:$0xff] }
  0x63   : > { %665 = vmatpush.msrb.mxu2 %v362_v44  ;;  %685 = vmatpush.msrb.mxu3 %v378_v45  ;;  %v428_v42 = vld [vmem:[%s1542_s8 + $0x540] sm:$0xff]  ;;  %v395_v44 = vld [vmem:[%s1542_s8 + $0x438] sm:$0xff] }
  0x64   : > { %621 = vmatpush.msrb.mxu0 %v329_v46  ;;  %641 = vmatpush.msrb.mxu1 %v345_v47  ;;  %v444_v43 = vld [vmem:[%s1542_s8 + $0x5c0] sm:$0xff]  ;;  %v411_v45 = vld [vmem:[%s1542_s8 + $0x4b8] sm:$0xff] }
  0x65   : > { %666 = vmatpush.msrb.mxu2 %v361_v48  ;;  %686 = vmatpush.msrb.mxu3 %v377_v49  ;;  %v427_v46 = vld [vmem:[%s1542_s8 + $0x538] sm:$0xff]  ;;  %v394_v48 = vld [vmem:[%s1542_s8 + $0x430] sm:$0xff]  ;;  %v388_v9 = vld [vmem:[%s1542_s8 + $0x400] sm:$0xff] }
  0x66   : > { %622 = vmatpush.msrb.mxu0 %v328_v50  ;;  %642 = vmatpush.msrb.mxu1 %v344_v51  ;;  %v443_v47 = vld [vmem:[%s1542_s8 + $0x5b8] sm:$0xff]  ;;  %v410_v49 = vld [vmem:[%s1542_s8 + $0x4b0] sm:$0xff] }
  0x67   : > { %667 = vmatpush.msrb.mxu2 %v360_v52  ;;  %687 = vmatpush.msrb.mxu3 %v376_v53  ;;  %v426_v50 = vld [vmem:[%s1542_s8 + $0x530] sm:$0xff]  ;;  %v393_v52 = vld [vmem:[%s1542_s8 + $0x428] sm:$0xff] }
  0x68   : > { %623 = vmatpush.msrb.mxu0 %v327_v54  ;;  %643 = vmatpush.msrb.mxu1 %v343_v55  ;;  %v442_v51 = vld [vmem:[%s1542_s8 + $0x5b0] sm:$0xff]  ;;  %v409_v53 = vld [vmem:[%s1542_s8 + $0x4a8] sm:$0xff] }
  0x69   : > { %668 = vmatpush.msrb.mxu2 %v359_v56  ;;  %688 = vmatpush.msrb.mxu3 %v375_v57  ;;  %v425_v54 = vld [vmem:[%s1542_s8 + $0x528] sm:$0xff]  ;;  %v392_v56 = vld [vmem:[%s1542_s8 + $0x420] sm:$0xff] }
  0x6a   : > { %624 = vmatpush.msrb.mxu0 %v326_v58  ;;  %644 = vmatpush.msrb.mxu1 %v342_v59  ;;  %v441_v55 = vld [vmem:[%s1542_s8 + $0x5a8] sm:$0xff]  ;;  %v408_v57 = vld [vmem:[%s1542_s8 + $0x4a0] sm:$0xff] }
  0x6b   : > { %669 = vmatpush.msrb.mxu2 %v358_v60  ;;  %689 = vmatpush.msrb.mxu3 %v374_v61  ;;  %v424_v58 = vld [vmem:[%s1542_s8 + $0x520] sm:$0xff]  ;;  %v391_v60 = vld [vmem:[%s1542_s8 + $0x418] sm:$0xff] }
  0x6c   : > { %625 = vmatpush.msrb.mxu0 %v325_v62  ;;  %645 = vmatpush.msrb.mxu1 %v341_v63  ;;  %v440_v59 = vld [vmem:[%s1542_s8 + $0x5a0] sm:$0xff]  ;;  %v407_v61 = vld [vmem:[%s1542_s8 + $0x498] sm:$0xff] }
  0x6d   : > { %670 = vmatpush.msrb.mxu2 %v357_v1  ;;  %690 = vmatpush.msrb.mxu3 %v373_v2  ;;  %v423_v62 = vld [vmem:[%s1542_s8 + $0x518] sm:$0xff]  ;;  %v406_v1 = vld [vmem:[%s1542_s8 + $0x490] sm:$0xff] }
  0x6e   : > { %626 = vmatpush.msrb.mxu0 %v324_v3  ;;  %646 = vmatpush.msrb.mxu1 %v340_v4  ;;  %v439_v63 = vld [vmem:[%s1542_s8 + $0x598] sm:$0xff]  ;;  %v422_v2 = vld [vmem:[%s1542_s8 + $0x510] sm:$0xff]  ;;  %v389_v4 = vld [vmem:[%s1542_s8 + $0x408] sm:$0xff] }
  0x6f   : > { %671 = vmatpush.msrb.mxu2 %v356_v5  ;;  %691 = vmatpush.msrb.mxu3 %v372_v6  ;;  %v438_v3 = vld [vmem:[%s1542_s8 + $0x590] sm:$0xff]  ;;  %v405_v5 = vld [vmem:[%s1542_s8 + $0x488] sm:$0xff] }
  0x70   : > { %627 = vmatmul.f32.vlgmr.msrb.gmra.mxu0 %v607_v7  ;;  %647 = vmatmul.f32.vlgmr.msrb.gmra.mxu1 %v608_v8  ;;  %v256_v6 = vld [vmem:[%s1550_s6 + $0x8] sm:$0x3] }
  0x71   : > { %701 = vmatpush.msra.mxu0 %v403_v10  ;;  %721 = vmatpush.msra.mxu1 %v419_v11  ;;  %v421_v7 = vld [vmem:[%s1542_s8 + $0x508] sm:$0xff]  ;;  %v404_v10 = vld [vmem:[%s1542_s8 + $0x480] sm:$0xff] }
  0x72   : > { %746 = vmatpush.msra.mxu2 %v435_v12  ;;  %766 = vmatpush.msra.mxu3 %v451_v13  ;;  %v437_v8 = vld [vmem:[%s1542_s8 + $0x588] sm:$0xff]  ;;  %v420_v11 = vld [vmem:[%s1542_s8 + $0x500] sm:$0xff]  ;;  %v697_v13 = vperm.slane %v256_v6, 0 }
  0x73   : > { %672 = vmatmul.f32.vlgmr.msrb.gmra.mxu2 %v652_v14  ;;  %692 = vmatmul.f32.vlgmr.msrb.gmra.mxu3 %v653_v15  ;;  %v436_v12 = vld [vmem:[%s1542_s8 + $0x580] sm:$0xff]  ;;  %v698_v14 = vperm.slane %v256_v6, 1  ;;  %v257_v15 = vld [vmem:[%s1550_s6 + $0xa] sm:$0x3]  ;;  %v454_v6 = vld [vmem:[%s1542_s8 + $0x610] sm:$0xff] }
  0x74   : > { %702 = vmatpush.msra.mxu0 %v402_v16  ;;  %722 = vmatpush.msra.mxu1 %v418_v17  ;;  %v467_v16 = vld [vmem:[%s1542_s8 + $0x678] sm:$0xff] }
  0x75   : > { %747 = vmatpush.msra.mxu2 %v434_v18  ;;  %767 = vmatpush.msra.mxu3 %v450_v19  ;;  %v483_v17 = vld [vmem:[%s1542_s8 + $0x6f8] sm:$0xff] }
  0x76   : > { %703 = vmatpush.msra.mxu0 %v401_v20  ;;  %723 = vmatpush.msra.mxu1 %v417_v21  ;;  %v499_v18 = vld [vmem:[%s1542_s8 + $0x778] sm:$0xff]  ;;  %v742_v20 = vperm.slane %v257_v15, 0  ;;  %v743_v21 = vperm.slane %v257_v15, 1  ;;  %v501_v15 = vld [vmem:[%s1542_s8 + $0x788] sm:$0xff] }
  0x77   : > { %748 = vmatpush.msra.mxu2 %v433_v22  ;;  %768 = vmatpush.msra.mxu3 %v449_v23  ;;  %v515_v19 = vld [vmem:[%s1542_s8 + $0x7f8] sm:$0xff]  ;;  %v466_v22 = vld [vmem:[%s1542_s8 + $0x670] sm:$0xff] }
  0x78   : > { %704 = vmatpush.msra.mxu0 %v400_v24  ;;  %724 = vmatpush.msra.mxu1 %v416_v25  ;;  %v482_v23 = vld [vmem:[%s1542_s8 + $0x6f0] sm:$0xff] }
  0x79   : > { %749 = vmatpush.msra.mxu2 %v432_v26  ;;  %769 = vmatpush.msra.mxu3 %v448_v27  ;;  %v498_v24 = vld [vmem:[%s1542_s8 + $0x770] sm:$0xff]  ;;  %v465_v26 = vld [vmem:[%s1542_s8 + $0x668] sm:$0xff] }
  0x7a   : > { %705 = vmatpush.msra.mxu0 %v399_v28  ;;  %725 = vmatpush.msra.mxu1 %v415_v29  ;;  %v514_v25 = vld [vmem:[%s1542_s8 + $0x7f0] sm:$0xff]  ;;  %v481_v27 = vld [vmem:[%s1542_s8 + $0x6e8] sm:$0xff] }
  0x7b   : > { %750 = vmatpush.msra.mxu2 %v431_v30  ;;  %770 = vmatpush.msra.mxu3 %v447_v31  ;;  %v497_v28 = vld [vmem:[%s1542_s8 + $0x768] sm:$0xff]  ;;  %v464_v30 = vld [vmem:[%s1542_s8 + $0x660] sm:$0xff] }
  0x7c   : > { %706 = vmatpush.msra.mxu0 %v398_v32  ;;  %726 = vmatpush.msra.mxu1 %v414_v33  ;;  %v513_v29 = vld [vmem:[%s1542_s8 + $0x7e8] sm:$0xff]  ;;  %v480_v31 = vld [vmem:[%s1542_s8 + $0x6e0] sm:$0xff] }
  0x7d   : > { %751 = vmatpush.msra.mxu2 %v430_v34  ;;  %771 = vmatpush.msra.mxu3 %v446_v35  ;;  %v496_v32 = vld [vmem:[%s1542_s8 + $0x760] sm:$0xff]  ;;  %v463_v34 = vld [vmem:[%s1542_s8 + $0x658] sm:$0xff] }
  0x7e   : > { %707 = vmatpush.msra.mxu0 %v397_v36  ;;  %727 = vmatpush.msra.mxu1 %v413_v37  ;;  %v512_v33 = vld [vmem:[%s1542_s8 + $0x7e0] sm:$0xff]  ;;  %v479_v35 = vld [vmem:[%s1542_s8 + $0x6d8] sm:$0xff] }
  0x7f   : > { %752 = vmatpush.msra.mxu2 %v429_v38  ;;  %772 = vmatpush.msra.mxu3 %v445_v39  ;;  %v495_v36 = vld [vmem:[%s1542_s8 + $0x758] sm:$0xff]  ;;  %v462_v38 = vld [vmem:[%s1542_s8 + $0x650] sm:$0xff] }
  0x80   : > { %708 = vmatpush.msra.mxu0 %v396_v40  ;;  %728 = vmatpush.msra.mxu1 %v412_v41  ;;  %v511_v37 = vld [vmem:[%s1542_s8 + $0x7d8] sm:$0xff]  ;;  %v478_v39 = vld [vmem:[%s1542_s8 + $0x6d0] sm:$0xff] }
  0x81   : > { %753 = vmatpush.msra.mxu2 %v428_v42  ;;  %773 = vmatpush.msra.mxu3 %v444_v43  ;;  %v494_v40 = vld [vmem:[%s1542_s8 + $0x750] sm:$0xff]  ;;  %v461_v42 = vld [vmem:[%s1542_s8 + $0x648] sm:$0xff] }
  0x82   : > { %709 = vmatpush.msra.mxu0 %v395_v44  ;;  %729 = vmatpush.msra.mxu1 %v411_v45  ;;  %v510_v41 = vld [vmem:[%s1542_s8 + $0x7d0] sm:$0xff]  ;;  %v477_v43 = vld [vmem:[%s1542_s8 + $0x6c8] sm:$0xff] }
  0x83   : > { %754 = vmatpush.msra.mxu2 %v427_v46  ;;  %774 = vmatpush.msra.mxu3 %v443_v47  ;;  %v493_v44 = vld [vmem:[%s1542_s8 + $0x748] sm:$0xff]  ;;  %v460_v46 = vld [vmem:[%s1542_s8 + $0x640] sm:$0xff] }
  0x84   : > { %710 = vmatpush.msra.mxu0 %v394_v48  ;;  %730 = vmatpush.msra.mxu1 %v410_v49  ;;  %v509_v45 = vld [vmem:[%s1542_s8 + $0x7c8] sm:$0xff]  ;;  %v476_v47 = vld [vmem:[%s1542_s8 + $0x6c0] sm:$0xff] }
  0x85   : > { %755 = vmatpush.msra.mxu2 %v426_v50  ;;  %775 = vmatpush.msra.mxu3 %v442_v51  ;;  %v492_v48 = vld [vmem:[%s1542_s8 + $0x740] sm:$0xff]  ;;  %v459_v50 = vld [vmem:[%s1542_s8 + $0x638] sm:$0xff] }
  0x86   : > { %711 = vmatpush.msra.mxu0 %v393_v52  ;;  %731 = vmatpush.msra.mxu1 %v409_v53  ;;  %v508_v49 = vld [vmem:[%s1542_s8 + $0x7c0] sm:$0xff]  ;;  %v475_v51 = vld [vmem:[%s1542_s8 + $0x6b8] sm:$0xff] }
  0x87   : > { %756 = vmatpush.msra.mxu2 %v425_v54  ;;  %776 = vmatpush.msra.mxu3 %v441_v55  ;;  %v491_v52 = vld [vmem:[%s1542_s8 + $0x738] sm:$0xff]  ;;  %v458_v54 = vld [vmem:[%s1542_s8 + $0x630] sm:$0xff] }
  0x88   : > { %712 = vmatpush.msra.mxu0 %v392_v56  ;;  %732 = vmatpush.msra.mxu1 %v408_v57  ;;  %v507_v53 = vld [vmem:[%s1542_s8 + $0x7b8] sm:$0xff]  ;;  %v474_v55 = vld [vmem:[%s1542_s8 + $0x6b0] sm:$0xff] }
  0x89   : > { %757 = vmatpush.msra.mxu2 %v424_v58  ;;  %777 = vmatpush.msra.mxu3 %v440_v59  ;;  %v490_v56 = vld [vmem:[%s1542_s8 + $0x730] sm:$0xff]  ;;  %v457_v58 = vld [vmem:[%s1542_s8 + $0x628] sm:$0xff] }
  0x8a   : > { %713 = vmatpush.msra.mxu0 %v391_v60  ;;  %733 = vmatpush.msra.mxu1 %v407_v61  ;;  %v506_v57 = vld [vmem:[%s1542_s8 + $0x7b0] sm:$0xff]  ;;  %v473_v59 = vld [vmem:[%s1542_s8 + $0x6a8] sm:$0xff] }
  0x8b   : > { %758 = vmatpush.msra.mxu2 %v423_v62  ;;  %778 = vmatpush.msra.mxu3 %v439_v63  ;;  %v489_v60 = vld [vmem:[%s1542_s8 + $0x728] sm:$0xff]  ;;  %v456_v62 = vld [vmem:[%s1542_s8 + $0x620] sm:$0xff] }
  0x8c   : > { %714 = vmatpush.msra.mxu0 %v390_v0  ;;  %734 = vmatpush.msra.mxu1 %v406_v1  ;;  %v505_v61 = vld [vmem:[%s1542_s8 + $0x7a8] sm:$0xff]  ;;  %v472_v63 = vld [vmem:[%s1542_s8 + $0x6a0] sm:$0xff] }
  0x8d   : > { %759 = vmatpush.msra.mxu2 %v422_v2  ;;  %779 = vmatpush.msra.mxu3 %v438_v3  ;;  %v488_v0 = vld [vmem:[%s1542_s8 + $0x720] sm:$0xff]  ;;  %v455_v2 = vld [vmem:[%s1542_s8 + $0x618] sm:$0xff] }
  0x8e   : > { %715 = vmatpush.msra.mxu0 %v389_v4  ;;  %735 = vmatpush.msra.mxu1 %v405_v5  ;;  %v504_v1 = vld [vmem:[%s1542_s8 + $0x7a0] sm:$0xff]  ;;  %v471_v3 = vld [vmem:[%s1542_s8 + $0x698] sm:$0xff] }
  0x8f   : > { %760 = vmatpush.msra.mxu2 %v421_v7  ;;  %780 = vmatpush.msra.mxu3 %v437_v8  ;;  %v487_v4 = vld [vmem:[%s1542_s8 + $0x718] sm:$0xff]  ;;  %v470_v7 = vld [vmem:[%s1542_s8 + $0x690] sm:$0xff] }
  0x90   : > { %716 = vmatpush.msra.mxu0 %v388_v9  ;;  %736 = vmatpush.msra.mxu1 %v404_v10  ;;  %v503_v5 = vld [vmem:[%s1542_s8 + $0x798] sm:$0xff]  ;;  %v486_v8 = vld [vmem:[%s1542_s8 + $0x710] sm:$0xff]  ;;  %v1428_v10 = vmov 0.0  }
  0x91   : > { %761 = vmatpush.msra.mxu2 %v420_v11  ;;  %781 = vmatpush.msra.mxu3 %v436_v12  ;;  %v502_v9 = vld [vmem:[%s1542_s8 + $0x790] sm:$0xff]  ;;  %236 = vst [vmem:[%s1811_s15] sm:$0x1] %v1428_v10  ;;  %v453_v11 = vld [vmem:[%s1542_s8 + $0x608] sm:$0xff] }
  0x92   : > { %717 = vmatmul.f32.vlgmr.msra.gmra.mxu0 %v697_v13  ;;  %737 = vmatmul.f32.vlgmr.msra.gmra.mxu1 %v698_v14  ;;  %v469_v12 = vld [vmem:[%s1542_s8 + $0x688] sm:$0xff]  ;;  %237 = vst [vmem:[%s1811_s15 + $0x1] sm:$0x1] %v1428_v10 }
  0x93   : > { %791 = vmatpush.msrb.mxu0 %v467_v16  ;;  %811 = vmatpush.msrb.mxu1 %v483_v17  ;;  %v258_v13 = vld [vmem:[%s1550_s6 + $0xc] sm:$0x3]  ;;  %v259_v16 = vld [vmem:[%s1550_s6 + $0xe] sm:$0x3]  ;;  %238 = vst [vmem:[%s1811_s15 + $0x2] sm:$0x1] %v1428_v10 }
  0x94   : > { %836 = vmatpush.msrb.mxu2 %v499_v18  ;;  %856 = vmatpush.msrb.mxu3 %v515_v19  ;;  %v485_v14 = vld [vmem:[%s1542_s8 + $0x708] sm:$0xff]  ;;  %v452_v17 = vld [vmem:[%s1542_s8 + $0x600] sm:$0xff]  ;;  %239 = vst [vmem:[%s1811_s15 + $0x3] sm:$0x1] %v1428_v10 }
  0x95   : > { %762 = vmatmul.f32.vlgmr.msra.gmra.mxu2 %v742_v20  ;;  %782 = vmatmul.f32.vlgmr.msra.gmra.mxu3 %v743_v21  ;;  %v468_v18 = vld [vmem:[%s1542_s8 + $0x680] sm:$0xff]  ;;  %v787_v21 = vperm.slane %v258_v13, 0  ;;  %240 = vst [vmem:[%s1811_s15 + $0x4] sm:$0x1] %v1428_v10 }
  0x96   : > { %792 = vmatpush.msrb.mxu0 %v466_v22  ;;  %812 = vmatpush.msrb.mxu1 %v482_v23  ;;  %v484_v19 = vld [vmem:[%s1542_s8 + $0x700] sm:$0xff]  ;;  %v788_v22 = vperm.slane %v258_v13, 1  ;;  %v832_v23 = vperm.slane %v259_v16, 0  ;;  %241 = vst [vmem:[%s1811_s15 + $0x5] sm:$0x1] %v1428_v10 }
  0x97   : > { %837 = vmatpush.msrb.mxu2 %v498_v24  ;;  %857 = vmatpush.msrb.mxu3 %v514_v25  ;;  %v500_v20 = vld [vmem:[%s1542_s8 + $0x780] sm:$0xff]  ;;  %v833_v24 = vperm.slane %v259_v16, 1  ;;  %242 = vst [vmem:[%s1811_s15 + $0x6] sm:$0x1] %v1428_v10 }
  0x98   : > { %793 = vmatpush.msrb.mxu0 %v465_v26  ;;  %813 = vmatpush.msrb.mxu1 %v481_v27  ;;  %243 = vst [vmem:[%s1811_s15 + $0x7] sm:$0x1] %v1428_v10  ;;  %v244_v26 = vld [vmem:[%s1811_s15] sm:$0x1] }
  0x99   : > { %838 = vmatpush.msrb.mxu2 %v497_v28  ;;  %858 = vmatpush.msrb.mxu3 %v513_v29 }
  0x9a   : > { %794 = vmatpush.msrb.mxu0 %v464_v30  ;;  %814 = vmatpush.msrb.mxu1 %v480_v31  ;;  %v245_v31 = vld [vmem:[%s1811_s15 + $0x1] sm:$0x1] }
  0x9b   : > { %839 = vmatpush.msrb.mxu2 %v496_v32  ;;  %859 = vmatpush.msrb.mxu3 %v512_v33 }
  0x9c   : > { %795 = vmatpush.msrb.mxu0 %v463_v34  ;;  %815 = vmatpush.msrb.mxu1 %v479_v35 }
  0x9d   : > { %840 = vmatpush.msrb.mxu2 %v495_v36  ;;  %860 = vmatpush.msrb.mxu3 %v511_v37 }
  0x9e   : > { %796 = vmatpush.msrb.mxu0 %v462_v38  ;;  %816 = vmatpush.msrb.mxu1 %v478_v39  ;;  %v250_v10 = vld [vmem:[%s1811_s15 + $0x6] sm:$0x1] }
  0x9f   : > { %841 = vmatpush.msrb.mxu2 %v494_v40  ;;  %861 = vmatpush.msrb.mxu3 %v510_v41 }
  0xa0   : > { %797 = vmatpush.msrb.mxu0 %v461_v42  ;;  %817 = vmatpush.msrb.mxu1 %v477_v43  ;;  %v246_v42 = vld [vmem:[%s1811_s15 + $0x2] sm:$0x1] }
  0xa1   : > { %842 = vmatpush.msrb.mxu2 %v493_v44  ;;  %862 = vmatpush.msrb.mxu3 %v509_v45 }
  0xa2   : > { %798 = vmatpush.msrb.mxu0 %v460_v46  ;;  %818 = vmatpush.msrb.mxu1 %v476_v47  ;;  %v247_v47 = vld [vmem:[%s1811_s15 + $0x3] sm:$0x1] }
  0xa3   : > { %843 = vmatpush.msrb.mxu2 %v492_v48  ;;  %863 = vmatpush.msrb.mxu3 %v508_v49 }
  0xa4   : > { %799 = vmatpush.msrb.mxu0 %v459_v50  ;;  %819 = vmatpush.msrb.mxu1 %v475_v51 }
  0xa5   : > { %844 = vmatpush.msrb.mxu2 %v491_v52  ;;  %864 = vmatpush.msrb.mxu3 %v507_v53 }
  0xa6   : > { %800 = vmatpush.msrb.mxu0 %v458_v54  ;;  %820 = vmatpush.msrb.mxu1 %v474_v55 }
  0xa7   : > { %845 = vmatpush.msrb.mxu2 %v490_v56  ;;  %865 = vmatpush.msrb.mxu3 %v506_v57 }
  0xa8   : > { %801 = vmatpush.msrb.mxu0 %v457_v58  ;;  %821 = vmatpush.msrb.mxu1 %v473_v59  ;;  %v248_v58 = vld [vmem:[%s1811_s15 + $0x4] sm:$0x1] }
  0xa9   : > { %846 = vmatpush.msrb.mxu2 %v489_v60  ;;  %866 = vmatpush.msrb.mxu3 %v505_v61 }
  0xaa   : > { %802 = vmatpush.msrb.mxu0 %v456_v62  ;;  %822 = vmatpush.msrb.mxu1 %v472_v63  ;;  %v249_v63 = vld [vmem:[%s1811_s15 + $0x5] sm:$0x1] }
  0xab   : > { %847 = vmatpush.msrb.mxu2 %v488_v0  ;;  %867 = vmatpush.msrb.mxu3 %v504_v1 }
  0xac   : > { %803 = vmatpush.msrb.mxu0 %v455_v2  ;;  %823 = vmatpush.msrb.mxu1 %v471_v3 }
  0xad   : > { %848 = vmatpush.msrb.mxu2 %v487_v4  ;;  %868 = vmatpush.msrb.mxu3 %v503_v5 }
  0xae   : > { %804 = vmatpush.msrb.mxu0 %v454_v6  ;;  %824 = vmatpush.msrb.mxu1 %v470_v7 }
  0xaf   : > { %849 = vmatpush.msrb.mxu2 %v486_v8  ;;  %869 = vmatpush.msrb.mxu3 %v502_v9 }
  0xb0   : > { %805 = vmatpush.msrb.mxu0 %v453_v11  ;;  %825 = vmatpush.msrb.mxu1 %v469_v12 }
  0xb1   : > { %850 = vmatpush.msrb.mxu2 %v485_v14  ;;  %870 = vmatpush.msrb.mxu3 %v501_v15  ;;  %v251_v15 = vld [vmem:[%s1811_s15 + $0x7] sm:$0x1] }
  0xb2   : > { %806 = vmatpush.msrb.mxu0 %v452_v17  ;;  %826 = vmatpush.msrb.mxu1 %v468_v18 }
  0xb3   : > { %851 = vmatpush.msrb.mxu2 %v484_v19  ;;  %871 = vmatpush.msrb.mxu3 %v500_v20 }
  0xb4   : > { %807 = vmatmul.f32.vlgmr.msrb.gmra.mxu0 %v787_v21  ;;  %827 = vmatmul.f32.vlgmr.msrb.gmra.mxu1 %v788_v22 }
  0xb5   : > { %852 = vmatmul.f32.vlgmr.msrb.gmra.mxu2 %v832_v23  ;;  %872 = vmatmul.f32.vlgmr.msrb.gmra.mxu3 %v833_v24 }
  0xca   : > { %v538_v25 = vpop.f32.mrf.mxu0 }
  0xcb   : > { %v558_v27 = vpop.f32.mrf.mxu1 }
  0xcc   : > { %v559_v28 = vadd.f32 %v558_v27, %v538_v25 }
  0xce   : > { %v876_v29 = vadd.f32 %v559_v28, %v244_v26 }
  0xd0   : > { %884 = vst [vmem:[%s1811_s15] sm:$0x1] %v876_v29 }
  0xd4   : > { %v583_v30 = vpop.f32.mrf.mxu2  ;;  %v603_v32 = vpop.f32.mrf.mxu3 }
  0xd5   : > { %v604_v33 = vadd.f32 %v603_v32, %v583_v30 }
  0xd7   : > { %v877_v34 = vadd.f32 %v604_v33, %v245_v31  ;;  %v1835_v35 = vld [vmem:[%s1811_s15] sm:$0x1] }
  0xd8   : > { %v903_v36 = vmul.f32 %v1835_v35, %v1835_v35 }
  0xd9   : > { %885 = vst [vmem:[%s1811_s15 + $0x1] sm:$0x1] %v877_v34 }
  0xda   : > { %v912_v37 = vsel %vm911_vm0, %v903_v36, 0.0 }
  0xdb   : > { %913 = vadd.xlane.f32.xlu0 %v912_v37 }
  0xe0   : > { %v1842_v38 = vld [vmem:[%s1811_s15 + $0x1] sm:$0x1] }
  0xe1   : > { %v904_v39 = vmul.f32 %v1842_v38, %v1842_v38 }
  0xe3   : > { %v915_v40 = vsel %vm911_vm0, %v904_v39, 0.0 }
  0xe4   : > { %916 = vadd.xlane.f32.xlu0 %v915_v40 }
  0xed   : > { %v628_v41 = vpop.f32.mrf.mxu0  ;;  %v648_v43 = vpop.f32.mrf.mxu1 }
  0xee   : > { %v649_v44 = vadd.f32 %v648_v43, %v628_v41 }
  0xf0   : > { %v878_v45 = vadd.f32 %v649_v44, %v246_v42 }
  0xf2   : > { %886 = vst [vmem:[%s1811_s15 + $0x2] sm:$0x1] %v878_v45 }
  0xf6   : > { %v673_v46 = vpop.f32.mrf.mxu2  ;;  %v693_v48 = vpop.f32.mrf.mxu3 }
  0xf7   : > { %v694_v49 = vadd.f32 %v693_v48, %v673_v46 }
  0xf9   : > { %v879_v50 = vadd.f32 %v694_v49, %v247_v47  ;;  %v1851_v51 = vld [vmem:[%s1811_s15 + $0x2] sm:$0x1] }
  0xfa   : > { %v905_v52 = vmul.f32 %v1851_v51, %v1851_v51 }
  0xfb   : > { %887 = vst [vmem:[%s1811_s15 + $0x3] sm:$0x1] %v879_v50 }
  0xfc   : > { %v918_v53 = vsel %vm911_vm0, %v905_v52, 0.0 }
  0xfd   : > { %919 = vadd.xlane.f32.xlu1 %v918_v53 }
 0x102   : > { %v1858_v54 = vld [vmem:[%s1811_s15 + $0x3] sm:$0x1] }
 0x103   : > { %v906_v55 = vmul.f32 %v1858_v54, %v1858_v54 }
 0x105   : > { %v921_v56 = vsel %vm911_vm0, %v906_v55, 0.0 }
 0x106   : > { %922 = vadd.xlane.f32.xlu1 %v921_v56 }
 0x10f   : > { %v718_v57 = vpop.f32.mrf.mxu0  ;;  %v738_v59 = vpop.f32.mrf.mxu1 }
 0x110   : > { %v739_v60 = vadd.f32 %v738_v59, %v718_v57 }
 0x112   : > { %v880_v61 = vadd.f32 %v739_v60, %v248_v58 }
 0x114   : > { %888 = vst [vmem:[%s1811_s15 + $0x4] sm:$0x1] %v880_v61 }
 0x118   : > { %v763_v62 = vpop.f32.mrf.mxu2  ;;  %v783_v0 = vpop.f32.mrf.mxu3 }
 0x119   : > { %v784_v1 = vadd.f32 %v783_v0, %v763_v62 }
 0x11b   : > { %v881_v2 = vadd.f32 %v784_v1, %v249_v63  ;;  %v1867_v3 = vld [vmem:[%s1811_s15 + $0x4] sm:$0x1] }
 0x11c   : > { %v907_v4 = vmul.f32 %v1867_v3, %v1867_v3 }
 0x11d   : > { %889 = vst [vmem:[%s1811_s15 + $0x5] sm:$0x1] %v881_v2 }
 0x11e   : > { %v924_v5 = vsel %vm911_vm0, %v907_v4, 0.0 }
 0x11f   : > { %925 = vadd.xlane.f32.xlu2 %v924_v5 }
 0x124   : > { %v1874_v6 = vld [vmem:[%s1811_s15 + $0x5] sm:$0x1] }
 0x125   : > { %v908_v7 = vmul.f32 %v1874_v6, %v1874_v6 }
 0x127   : > { %v927_v8 = vsel %vm911_vm0, %v908_v7, 0.0 }
 0x128   : > { %928 = vadd.xlane.f32.xlu2 %v927_v8 }
 0x131   : > { %v808_v9 = vpop.f32.mrf.mxu0  ;;  %v828_v11 = vpop.f32.mrf.mxu1 }
 0x132   : > { %v829_v12 = vadd.f32 %v828_v11, %v808_v9 }
 0x134   : > { %v882_v13 = vadd.f32 %v829_v12, %v250_v10 }
 0x136   : > { %890 = vst [vmem:[%s1811_s15 + $0x6] sm:$0x1] %v882_v13 }
 0x138   : > { %v853_v14 = vpop.f32.mrf.mxu2  ;;  %v873_v16 = vpop.f32.mrf.mxu3 }
 0x139   : > { %v874_v17 = vadd.f32 %v873_v16, %v853_v14 }
 0x13b   : > { %v883_v18 = vadd.f32 %v874_v17, %v251_v15 }
 0x13d   : > { %891 = vst [vmem:[%s1811_s15 + $0x7] sm:$0x1] %v883_v18  ;;  %v1884_v19 = vld [vmem:[%s1811_s15 + $0x6] sm:$0x1] }
 0x13e   : > { %v909_v20 = vmul.f32 %v1884_v19, %v1884_v19 }
 0x140   : > { %v930_v21 = vsel %vm911_vm0, %v909_v20, 0.0 }
 0x141   : > { %931 = vadd.xlane.f32.xlu0 %v930_v21 }
 0x144   : > { %v1890_v22 = vld [vmem:[%s1811_s15 + $0x7] sm:$0x1] }
 0x145   : > { %v910_v23 = vmul.f32 %v1890_v22, %v1890_v22 }
 0x147   : > { %v933_v24 = vsel %vm911_vm0, %v910_v23, 0.0 }
 0x148   : > { %934 = vadd.xlane.f32.xlu1 %v933_v24 }
 0x14e   : > { %v914_v25 = vpop.xlane.xlu0 %913 }
 0x14f   : > { %v936_v26 = vadd.f32 1e-06, %v914_v25 }
 0x151   : > { %1260 = vrsqrt.f32 %v936_v26  ;;  %vm950_vm1 = vweird.f32 %v936_v26 }
 0x157   : > { %v1261_v27 = vpop.eup %1260  ;;  %v917_v28 = vpop.xlane.xlu0 %916 }
 0x158   : > { %v945_v29 = vmul.f32 %v1261_v27, %v936_v26  ;;  %v937_v30 = vadd.f32 1e-06, %v917_v28  ;;  %vm951_vm2 = vweird.f32 %v1261_v27 }
 0x159   : > { %vm952_vm3 = vmor %vm950_vm1, %vm951_vm2 }
 0x15a   : > { %v946_v31 = vmul.f32 %v1261_v27, %v945_v29  ;;  %1262 = vrsqrt.f32 %v937_v30  ;;  %vm960_vm4 = vweird.f32 %v937_v30 }
 0x15c   : > { %v947_v32 = vmul.f32 0.5, %v946_v31 }
 0x15e   : > { %v948_v33 = vsub.f32 1.5, %v947_v32 }
 0x160   : > { %v1263_v34 = vpop.eup %1262  ;;  %v949_v36 = vmul.f32 %v1261_v27, %v948_v33 }
 0x161   : > { %v955_v37 = vmul.f32 %v1263_v34, %v937_v30  ;;  %vm961_vm5 = vweird.f32 %v1263_v34 }
 0x162   : > { %v953_v39 = vsel %vm952_vm3, %v1261_v27, %v949_v36  ;;  %vm962_vm6 = vmor %vm960_vm4, %vm961_vm5 }
 0x163   : > { %v1024_v40 = vmul.f32 %v953_v39, %v1835_v35  ;;  %v956_v41 = vmul.f32 %v1263_v34, %v955_v37 }
 0x165   : > { %1032 = vst [vmem:[%s1811_s15] sm:$0x1] %v1024_v40  ;;  %v957_v42 = vmul.f32 0.5, %v956_v41 }
 0x167   : > { %v958_v43 = vsub.f32 1.5, %v957_v42 }
 0x169   : > { %v959_v44 = vmul.f32 %v1263_v34, %v958_v43 }
 0x16b   : > { %v963_v45 = vsel %vm962_vm6, %v1263_v34, %v959_v44 }
 0x16c   : > { %v1025_v46 = vmul.f32 %v963_v45, %v1842_v38 }
 0x16e   : > { %1033 = vst [vmem:[%s1811_s15 + $0x1] sm:$0x1] %v1025_v46 }
 0x170   : > { %v920_v47 = vpop.xlane.xlu1 %919 }
 0x171   : > { %v938_v48 = vadd.f32 1e-06, %v920_v47 }
 0x173   : > { %1264 = vrsqrt.f32 %v938_v48  ;;  %vm970_vm7 = vweird.f32 %v938_v48 }
 0x179   : > { %v1265_v49 = vpop.eup %1264  ;;  %v923_v50 = vpop.xlane.xlu1 %922 }
 0x17a   : > { %v965_v52 = vmul.f32 %v1265_v49, %v938_v48  ;;  %v939_v35 = vadd.f32 1e-06, %v923_v50  ;;  %vm971_vm8 = vweird.f32 %v1265_v49 }
 0x17b   : > { %vm972_vm9 = vmor %vm970_vm7, %vm971_vm8 }
 0x17c   : > { %v966_v53 = vmul.f32 %v1265_v49, %v965_v52  ;;  %1266 = vrsqrt.f32 %v939_v35  ;;  %vm980_vm10 = vweird.f32 %v939_v35 }
 0x17e   : > { %v967_v55 = vmul.f32 0.5, %v966_v53 }
 0x180   : > { %v968_v56 = vsub.f32 1.5, %v967_v55 }
 0x182   : > { %v1267_v57 = vpop.eup %1266  ;;  %v969_v58 = vmul.f32 %v1265_v49, %v968_v56 }
 0x183   : > { %v975_v38 = vmul.f32 %v1267_v57, %v939_v35  ;;  %vm981_vm11 = vweird.f32 %v1267_v57 }
 0x184   : > { %v973_v59 = vsel %vm972_vm9, %v1265_v49, %v969_v58  ;;  %vm982_vm12 = vmor %vm980_vm10, %vm981_vm11 }
 0x185   : > { %v1026_v60 = vmul.f32 %v973_v59, %v1851_v51  ;;  %v976_v61 = vmul.f32 %v1267_v57, %v975_v38 }
 0x187   : > { %1034 = vst [vmem:[%s1811_s15 + $0x2] sm:$0x1] %v1026_v60  ;;  %v977_v62 = vmul.f32 0.5, %v976_v61 }
 0x189   : > { %v978_v63 = vsub.f32 1.5, %v977_v62 }
 0x18b   : > { %v979_v0 = vmul.f32 %v1267_v57, %v978_v63 }
 0x18d   : > { %v983_v1 = vsel %vm982_vm12, %v1267_v57, %v979_v0 }
 0x18e   : > { %v1027_v2 = vmul.f32 %v983_v1, %v1858_v54 }
 0x190   : > { %1035 = vst [vmem:[%s1811_s15 + $0x3] sm:$0x1] %v1027_v2 }
 0x192   : > { %v926_v4 = vpop.xlane.xlu2 %925 }
 0x193   : > { %v940_v5 = vadd.f32 1e-06, %v926_v4 }
 0x195   : > { %1268 = vrsqrt.f32 %v940_v5  ;;  %vm990_vm13 = vweird.f32 %v940_v5 }
 0x19b   : > { %v1269_v7 = vpop.eup %1268  ;;  %v929_v8 = vpop.xlane.xlu2 %928 }
 0x19c   : > { %v985_v9 = vmul.f32 %v1269_v7, %v940_v5  ;;  %v941_v51 = vadd.f32 1e-06, %v929_v8  ;;  %vm991_vm14 = vweird.f32 %v1269_v7 }
 0x19d   : > { %vm992_vm15 = vmor %vm990_vm13, %vm991_vm14 }
 0x19e   : > { %v986_v10 = vmul.f32 %v1269_v7, %v985_v9  ;;  %1270 = vrsqrt.f32 %v941_v51  ;;  %vm1000_vm0 = vweird.f32 %v941_v51 }
 0x1a0   : > { %v987_v11 = vmul.f32 0.5, %v986_v10 }
 0x1a2   : > { %v988_v12 = vsub.f32 1.5, %v987_v11 }
 0x1a4   : > { %v1271_v13 = vpop.eup %1270  ;;  %v989_v14 = vmul.f32 %v1269_v7, %v988_v12 }
 0x1a5   : > { %v995_v54 = vmul.f32 %v1271_v13, %v941_v51  ;;  %vm1001_vm1 = vweird.f32 %v1271_v13 }
 0x1a6   : > { %v993_v15 = vsel %vm992_vm15, %v1269_v7, %v989_v14  ;;  %vm1002_vm2 = vmor %vm1000_vm0, %vm1001_vm1 }
 0x1a7   : > { %v1028_v16 = vmul.f32 %v993_v15, %v1867_v3  ;;  %v996_v17 = vmul.f32 %v1271_v13, %v995_v54 }
 0x1a9   : > { %1036 = vst [vmem:[%s1811_s15 + $0x4] sm:$0x1] %v1028_v16  ;;  %v997_v18 = vmul.f32 0.5, %v996_v17 }
 0x1ab   : > { %v998_v20 = vsub.f32 1.5, %v997_v18 }
 0x1ad   : > { %v999_v21 = vmul.f32 %v1271_v13, %v998_v20 }
 0x1af   : > { %v1003_v23 = vsel %vm1002_vm2, %v1271_v13, %v999_v21 }
 0x1b0   : > { %v1029_v24 = vmul.f32 %v1003_v23, %v1874_v6 }
 0x1b2   : > { %1037 = vst [vmem:[%s1811_s15 + $0x5] sm:$0x1] %v1029_v24 }
 0x1b4   : > { %v932_v25 = vpop.xlane.xlu0 %931 }
 0x1b5   : > { %v942_v26 = vadd.f32 1e-06, %v932_v25 }
 0x1b7   : > { %1272 = vrsqrt.f32 %v942_v26  ;;  %vm1010_vm3 = vweird.f32 %v942_v26 }
 0x1bb   : > { %v935_v27 = vpop.xlane.xlu1 %934 }
 0x1bc   : > { %v943_v28 = vadd.f32 1e-06, %v935_v27 }
 0x1bd   : > { %v1273_v29 = vpop.eup %1272 }
 0x1be   : > { %v1005_v3 = vmul.f32 %v1273_v29, %v942_v26  ;;  %1274 = vrsqrt.f32 %v943_v28  ;;  %vm1011_vm4 = vweird.f32 %v1273_v29  ;;  %vm1020_vm7 = vweird.f32 %v943_v28 }
 0x1bf   : > { %vm1012_vm5 = vmor %vm1010_vm3, %vm1011_vm4 }
 0x1c0   : > { %v1006_v30 = vmul.f32 %v1273_v29, %v1005_v3 }
 0x1c2   : > { %v1007_v31 = vmul.f32 0.5, %v1006_v30 }
 0x1c4   : > { %v1275_v32 = vpop.eup %1274  ;;  %v1008_v33 = vsub.f32 1.5, %v1007_v31 }
 0x1c5   : > { %v1015_v34 = vmul.f32 %v1275_v32, %v943_v28  ;;  %vm1021_vm6 = vweird.f32 %v1275_v32 }
 0x1c6   : > { %v1009_v6 = vmul.f32 %v1273_v29, %v1008_v33  ;;  %vm1022_vm8 = vmor %vm1020_vm7, %vm1021_vm6 }
 0x1c7   : > { %v1016_v36 = vmul.f32 %v1275_v32, %v1015_v34 }
 0x1c8   : > { %v1013_v37 = vsel %vm1012_vm5, %v1273_v29, %v1009_v6 }
 0x1c9   : > { %v1030_v39 = vmul.f32 %v1013_v37, %v1884_v19  ;;  %v1017_v40 = vmul.f32 0.5, %v1016_v36 }
 0x1cb   : > { %1038 = vst [vmem:[%s1811_s15 + $0x6] sm:$0x1] %v1030_v39  ;;  %v1018_v41 = vsub.f32 1.5, %v1017_v40 }
 0x1cd   : > { %v1019_v42 = vmul.f32 %v1275_v32, %v1018_v41 }
 0x1cf   : > { %v1023_v43 = vsel %vm1022_vm8, %v1275_v32, %v1019_v42 }
 0x1d0   : > { %v1031_v19 = vmul.f32 %v1023_v43, %v1890_v22 }
 0x1d2   : > { %1039 = vst [vmem:[%s1811_s15 + $0x7] sm:$0x1] %v1031_v19 }
 0x1d3   : > { %1363 = shalt.err (!%p1360_p13)
}
 0x1d4   : > { %s1429_s4 = smov 16   ;;  %s1430_s0 = smov 1  }
 0x1d5   : > { %1190 = dma.vmem_to_hbm [thread:$0]  (%p1497_p9), %s1053_s19, 128, %s1055_s27, %s1041_s12, %s1429_s4, %s1429_s4, %s1430_s0  }
 0x1d6 PF: > { %s1069_s25 = sand.u32 1, %s1402_s9   ;;  %p1200_p0 = pnand %p1167_p12, %p1504_p11 }
 0x1d7   : > { %s1070_s6 = scalar_lea.sflag [#allocation4], %s1069_s25 }
 0x1d8   : > { %p1201_p1 = pneg %p1200_p0 }
 0x1da   : > { %1397 = dma.done.wait (%p1201_p1), %s1070_s6, 128  }
 0x1db   : > { %1399 = vsyncadd (%p1201_p1), %s1070_s6, 4294967168  ;;  %s21_s14 = sadd.s32 1, %s1422_s14   ;;  %s1960_s9 = smov %s1406_s10 }
 0x1dc   : > { %p18_p2 = scmp.ge.s32.totalorder %s21_s14, 4   ;;  %s1961_s10 = smov %s1410_s11 }
 0x1dd   : > { %s1962_s11 = smov %s1502_s23  ;;  %s1963_s12 = smov %s1418_s13 }
 0x1de   : > { %s1964_s13 = smov %s1966_s17  ;;  %20 = sbr.rel (!%p18_p2) target bundleno = 10 (0xa), region = 94 }
 0x1e3   :  { %1076 = vsyncpa [#allocation3], 1 }
 0x1e4   :  { %1078 = vsyncpa [#allocation3 + $0x1], 1 }
 0x1e5   :  { %1079 = vsyncpa [#allocation6], 1 }
 0x1e6   :  { %1081 = vsyncpa [#allocation6 + $0x1], 1 }
 0x1e7   :  { %1082 = vsyncpa [#allocation4], 1 }
 0x1e8   :  { %1084 = vsyncpa [#allocation4 + $0x1], 1 }

</bundles_post_ra>
